<compile_context>
chip_gen: v7x
topology: tpu7x:2x2x1
jax: 0.10.0
libtpu: 0.0.40
codegen_flags: <defaults>
</compile_context>

<pallas_src>
import functools

import jax
import jax.numpy as jnp
from jax.experimental import pallas as pl
from jax.experimental.pallas import tpu as pltpu


def _round_up(x: int, m: int) -> int:
    return ((x + m - 1) // m) * m


def _cdiv(a: int, b: int) -> int:
    return (a + b - 1) // b


# ------------------------------- kernels ------------------------------------


def _single_pass_kernel(h_ref, w_ref, o_ref, *, apply_relu, compute_dtype):
    """Whole-K block per grid point: no accumulator, no pl.when.

    Operands are cast to the MXU compute dtype on the VPU *inside* the kernel,
    so HBM only ever moves the original (typically f32) arrays once.
    """
    acc = jnp.dot(
        h_ref[...].astype(compute_dtype),
        w_ref[...].astype(compute_dtype),
        preferred_element_type=jnp.float32,
    )
    if apply_relu:
        acc = jnp.maximum(acc, 0.0)
    o_ref[...] = acc.astype(o_ref.dtype)


def _kloop_f32out_kernel(h_ref, w_ref, o_ref, *, apply_relu, compute_dtype):
    """K tiled along grid axis 2 (must remain the last / 'arbitrary' axis):
    the f32 output tile stays VMEM-resident across the k sweep and doubles as
    the accumulator (no scratch, no epilogue copy)."""
    k = pl.program_id(2)

    @pl.when(k == 0)
    def _():
        o_ref[...] = jnp.zeros_like(o_ref)

    o_ref[...] += jnp.dot(
        h_ref[...].astype(compute_dtype),
        w_ref[...].astype(compute_dtype),
        preferred_element_type=jnp.float32,
    )

    if apply_relu:

        @pl.when(k == pl.num_programs(2) - 1)
        def _():
            o_ref[...] = jnp.maximum(o_ref[...], 0.0)


def _kloop_acc_kernel(h_ref, w_ref, o_ref, acc_ref, *, apply_relu, compute_dtype):
    """Fallback for non-f32 outputs: separate f32 scratch accumulator."""
    k = pl.program_id(2)

    @pl.when(k == 0)
    def _():
        acc_ref[...] = jnp.zeros_like(acc_ref)

    acc_ref[...] += jnp.dot(
        h_ref[...].astype(compute_dtype),
        w_ref[...].astype(compute_dtype),
        preferred_element_type=jnp.float32,
    )

    @pl.when(k == pl.num_programs(2) - 1)
    def _():
        acc = acc_ref[...]
        if apply_relu:
            acc = jnp.maximum(acc, 0.0)
        o_ref[...] = acc.astype(o_ref.dtype)


# ------------------------------- wrapper ------------------------------------


def _vmem_budget_bytes() -> int:
    """Generation-aware scoped-VMEM budget.

    ~0.75 of physical VMEM, capped at 96 MiB:
      v7x (64 MiB physical)  -> 48 MiB scoped budget
      v5e/v6e (128 MiB)      -> 96 MiB scoped budget
    """
    try:
        phys = int(pltpu.get_tpu_info().vmem_capacity_bytes)
    except Exception:
        phys = 64 * 1024 * 1024  # conservative (v7x-sized) fallback
    return min((phys * 3) // 4, 96 * 1024 * 1024)


def node_apply(
    h,
    w_t,
    *,
    apply_relu=True,
    tm=512,
    tn=512,
    tk=2048,
    compute_dtype=jnp.bfloat16,
    vmem_limit_bytes=None,
    single_pass=None,            # None = auto from the VMEM budget
    small_problem_flops=2_000_000,
):
    """activation(h @ w_t) with a tiled Pallas TPU kernel.

    h:   [N, in_feats]            (node.data['h'])
    w_t: [in_feats, out_feats]    (transposed nn.Linear weight, bias=False)

    Set compute_dtype=jnp.float32 for exact parity with PyTorch's f32 Linear
    (default bf16 MXU inputs with f32 accumulation, fine for GCN inference).
    """
    N, K = h.shape
    Kw, M = w_t.shape
    assert K == Kw, "h and w_t contraction dims must match"
    out_dtype = h.dtype

    # Small-problem fast path: a pallas_call launch plus plumbing dwarfs a
    # few-KFLOP matmul; let XLA fuse it (also exact f32).
    if small_problem_flops and 2 * N * K * M < small_problem_flops:
        out = h @ w_t
        return jnp.maximum(out, 0.0).astype(out_dtype) if apply_relu else out

    if vmem_limit_bytes is None:
        vmem_limit_bytes = _vmem_budget_bytes()
    budget = int(vmem_limit_bytes * 0.9)

    h_b = jnp.dtype(h.dtype).itemsize
    w_b = jnp.dtype(w_t.dtype).itemsize
    o_b = jnp.dtype(out_dtype).itemsize
    c_b = jnp.dtype(compute_dtype).itemsize

    # ---- tile sizing: (8/16, 128)-aligned blocks, no N/M padding (cdiv grids,
    # Pallas masks edge-block stores), balanced row blocks to minimize waste.
    row_g = 16 if c_b < 4 else 8                     # bf16 packs 16 sublanes/vreg
    tm_req = max(_round_up(tm, row_g), row_g)
    n_row_blocks = _cdiv(N, tm_req)
    tm_eff = _round_up(_cdiv(N, n_row_blocks), row_g)

    M_lane = _round_up(M, 128)                       # lane-dense output width
    tn_cap = min(max(_round_up(tn, 128), 128), M_lane)

    def sp_bytes(tn_e):                              # single pass (whole K resident)
        return 2 * (tm_eff * K * h_b + K * tn_e * w_b + tm_eff * tn_e * o_b)

    def kl_bytes(tn_e, tk_e):                        # k-loop path
        acc = 0 if jnp.dtype(out_dtype) == jnp.dtype(jnp.float32) else tm_eff * tn_e * 4
        return 2 * (tm_eff * tk_e * h_b + tk_e * tn_e * w_b + tm_eff * tn_e * 4) + acc

    cost = pl.CostEstimate(
        flops=2 * N * K * M,
        transcendentals=0,
        bytes_accessed=N * K * h_b + K * M * w_b + N * M * o_b,
    )

    if single_pass is None:
        single_pass = min(sp_bytes(M_lane), sp_bytes(tn_cap)) <= budget

    if single_pass:
        # Full output width whenever the weight slab fits the budget: the
        # weight block index is then constant -> DMA'd exactly once, and the
        # output slab is lane-dense (unmasked vst).
        tn_eff = M_lane if sp_bytes(M_lane) <= budget else tn_cap
        grid_i = _cdiv(N, tm_eff)
        grid_j = _cdiv(M, tn_eff)
        # Cast the weight in HBM only if it is actually re-streamed.
        w_streams = 1 if grid_j == 1 else grid_i
        w_in = w_t.astype(compute_dtype) if (w_streams > 1 and c_b < w_b) else w_t

        return pl.pallas_call(
            functools.partial(
                _single_pass_kernel, apply_relu=apply_relu, compute_dtype=compute_dtype
            ),
            out_shape=jax.ShapeDtypeStruct((N, M), out_dtype),
            grid_spec=pltpu.PrefetchScalarGridSpec(
                num_scalar_prefetch=0,
                grid=(grid_i, grid_j),
                in_specs=[
                    pl.BlockSpec((tm_eff, K), lambda i, j: (i, 0)),
                    pl.BlockSpec((K, tn_eff), lambda i, j: (0, j)),
                ],
                out_specs=pl.BlockSpec((tm_eff, tn_eff), lambda i, j: (i, j)),
            ),
            compiler_params=pltpu.CompilerParams(
                dimension_semantics=("parallel", "parallel"),
                vmem_limit_bytes=vmem_limit_bytes,
            ),
            cost_estimate=cost,
        )(h, w_in)

    # -------------------- K-tiled path (large in_feats) ----------------------
    K_lane = _round_up(K, 128)
    tk_eff = min(max(_round_up(tk, 128), 128), K_lane)
    tn_eff = M_lane if kl_bytes(M_lane, tk_eff) <= budget else tn_cap
    while kl_bytes(tn_eff, tk_eff) > budget and tk_eff > 256:
        tk_eff = _round_up(max(tk_eff // 2, 256), 128)
    # Balance k tiles so the required zero-pad of K is minimal.
    n_k = _cdiv(K_lane, tk_eff)
    tk_eff = _round_up(_cdiv(K, n_k), 128)
    K_pad = n_k * tk_eff

    grid_i = _cdiv(N, tm_eff)
    grid_j = _cdiv(M, tn_eff)

    # Weight is re-streamed once per row-block sweep; cast it once in HBM when
    # that saves bandwidth. h itself is never cast/copied in HBM.
    w_in = w_t.astype(compute_dtype) if (grid_i > 1 and c_b < w_b) else w_t
    h_in = h
    if K_pad != K:  # zeros are required along the contraction dim only
        h_in = jnp.pad(h_in, ((0, 0), (0, K_pad - K)))
        w_in = jnp.pad(w_in, ((0, K_pad - K), (0, 0)))

    if jnp.dtype(out_dtype) == jnp.dtype(jnp.float32):
        kernel = functools.partial(
            _kloop_f32out_kernel, apply_relu=apply_relu, compute_dtype=compute_dtype
        )
        scratch = []
    else:
        kernel = functools.partial(
            _kloop_acc_kernel, apply_relu=apply_relu, compute_dtype=compute_dtype
        )
        scratch = [pltpu.VMEM((tm_eff, tn_eff), jnp.float32)]

    # NOTE: k MUST remain the last grid axis ('arbitrary'); the output block is
    # the accumulator and is only resident while the (i, j) index is fixed.
    return pl.pallas_call(
        kernel,
        out_shape=jax.ShapeDtypeStruct((N, M), out_dtype),
        grid_spec=pltpu.PrefetchScalarGridSpec(
            num_scalar_prefetch=0,
            grid=(grid_i, grid_j, n_k),
            in_specs=[
                pl.BlockSpec((tm_eff, tk_eff), lambda i, j, k: (i, k)),
                pl.BlockSpec((tk_eff, tn_eff), lambda i, j, k: (k, j)),
            ],
            out_specs=pl.BlockSpec((tm_eff, tn_eff), lambda i, j, k: (i, j)),
            scratch_shapes=scratch,
        ),
        compiler_params=pltpu.CompilerParams(
            dimension_semantics=("parallel", "parallel", "arbitrary"),
            vmem_limit_bytes=vmem_limit_bytes,
        ),
        cost_estimate=cost,
    )(h_in, w_in)


if __name__ == "__main__":
    # Demo scale implied by the module usage: 8 graph nodes, in=32, out=32.
    N, IN_FEATS, OUT_FEATS = 8, 32, 32

    key = jax.random.PRNGKey(0)
    k_h, k_w = jax.random.split(key)

    # node.data['h']
    h = jax.random.normal(k_h, (N, IN_FEATS), dtype=jnp.float32)

    # nn.Linear(in, out, bias=False) weight in PyTorch layout [out, in]; pre-transpose.
    bound = 1.0 / (IN_FEATS ** 0.5)
    w = jax.random.uniform(
        k_w, (OUT_FEATS, IN_FEATS), dtype=jnp.float32, minval=-bound, maxval=bound
    )
    w_t = w.T  # [in_feats, out_feats]
    ref = jnp.maximum(h @ w.T, 0.0)

    # 1) Force the Pallas single-pass kernel at demo scale (the default would
    #    route a 16-KFLOP problem to the fused-XLA fast path).
    out = jax.block_until_ready(node_apply(h, w_t, small_problem_flops=0))
    assert out.shape == (N, OUT_FEATS)
    # bf16 MXU inputs with f32 accumulation -> relaxed tolerance vs f32 ref.
    assert jnp.allclose(out, ref, atol=2e-2, rtol=2e-2), float(
        jnp.max(jnp.abs(out - ref))
    )

    # 2) Default call exercises the small-problem fast path (exact f32).
    out_fast = jax.block_until_ready(node_apply(h, w_t))
    assert jnp.allclose(out_fast, ref, atol=1e-5, rtol=1e-5)

    # 3) K-tiled accumulator path + edge-block masking on non-aligned shapes
    #    (single-pass disabled and tk shrunk to force a 3-step k sweep).
    N2, IN2, OUT2 = 300, 384, 96
    k_h2, k_w2 = jax.random.split(jax.random.PRNGKey(1))
    h2 = jax.random.normal(k_h2, (N2, IN2), dtype=jnp.float32)
    b2 = 1.0 / (IN2 ** 0.5)
    w2 = jax.random.uniform(
        k_w2, (OUT2, IN2), dtype=jnp.float32, minval=-b2, maxval=b2
    )
    out2 = jax.block_until_ready(
        node_apply(h2, w2.T, tk=128, single_pass=False, small_problem_flops=0)
    )
    ref2 = jnp.maximum(h2 @ w2.T, 0.0)
    assert out2.shape == (N2, OUT2)
    assert jnp.allclose(out2, ref2, atol=2e-2, rtol=2e-2), float(
        jnp.max(jnp.abs(out2 - ref2))
    )

    print("KERNEL_OK")
</pallas_src>

<mosaic_0001>
module attributes {stable_mosaic.version = 11 : i64} {
  func.func @_single_pass_kernel(%arg0: i32, %arg1: i32, %arg2: memref<16x32xf32, #tpu.memory_space<vmem>>, %arg3: memref<32x128xf32, #tpu.memory_space<vmem>>, %arg4: memref<16x128xf32, #tpu.memory_space<vmem>>) attributes {dimension_semantics = [#tpu.dimension_semantics<parallel>, #tpu.dimension_semantics<parallel>], iteration_bounds = array<i64: 1, 1>, scalar_prefetch = 0 : i64, scratch_operands = 0 : i64, tpu.core_type = #tpu.core_type<tc>, window_params = [{transform_indices = @transform_0, window_bounds = array<i64: 16, 32>}, {transform_indices = @transform_1, window_bounds = array<i64: 32, 128>}, {transform_indices = @transform_2, window_bounds = array<i64: 16, 128>}]} {
    %c0 = arith.constant 0 : index
    %c0_0 = arith.constant 0 : index
    %0 = vector.load %arg2[%c0, %c0_0] : memref<16x32xf32, #tpu.memory_space<vmem>>, vector<16x32xf32>
    %1 = arith.truncf %0 : vector<16x32xf32> to vector<16x32xbf16>
    %c0_1 = arith.constant 0 : index
    %c0_2 = arith.constant 0 : index
    %2 = vector.load %arg3[%c0_1, %c0_2] : memref<32x128xf32, #tpu.memory_space<vmem>>, vector<32x128xf32>
    %3 = arith.truncf %2 : vector<32x128xf32> to vector<32x128xbf16>
    %cst = arith.constant dense<0.000000e+00> : vector<16x128xf32>
    %4 = tpu.matmul %1, %3, %cst {dimension_numbers = #tpu.dot_dimension_numbers<[1], [0], [0], [1], [0, 0, 1, 1], [], []>} : vector<16x32xbf16>, vector<32x128xbf16>, vector<16x128xf32> -> vector<16x128xf32>
    %cst_3 = arith.constant 0.000000e+00 : f32
    %5 = vector.broadcast %cst_3 : f32 to vector<16x128xf32>
    %6 = arith.maximumf %4, %5 : vector<16x128xf32>
    %c0_4 = arith.constant 0 : index
    %c0_5 = arith.constant 0 : index
    %7 = vector.load %arg4[%c0_4, %c0_5] : memref<16x128xf32, #tpu.memory_space<vmem>>, vector<16x128xf32>
    tpu.vector_store %arg4[%c0_4, %c0_5], %6 {strides = array<i32>} : memref<16x128xf32, #tpu.memory_space<vmem>>, vector<16x128xf32>,
    return
  }
  func.func @transform_0(%arg0: i32, %arg1: i32) -> (i32, i32) {
    %c0_i32 = arith.constant 0 : i32
    %c0_i32_0 = arith.constant 0 : i32
    return %arg0, %c0_i32 : i32, i32
  }
  func.func @transform_1(%arg0: i32, %arg1: i32) -> (i32, i32) {
    %c0_i32 = arith.constant 0 : i32
    %c0_i32_0 = arith.constant 0 : i32
    return %c0_i32, %arg1 : i32, i32
  }
  func.func @transform_2(%arg0: i32, %arg1: i32) -> (i32, i32) {
    %c0_i32 = arith.constant 0 : i32
    return %arg0, %arg1 : i32, i32
  }
}

</mosaic_0001>

<bundles_post_ra>
// kernel: tpu_custom_call.1
= control target key start
LH: loop header
LB: loop body
LE: loop exit
PB: predicated region body
PF: predicated region fallthrough
CT: control target
= control target key end

     0   :  { %7 = vsyncpa [#allocation3], 0  ;;  %s275_s0 = inlined_call_operand.hbm [shape: f32[8,32], index: 0, kind: input, shape index: {}]   ;;  %s276_s1 = inlined_call_operand.hbm [shape: f32[32,32], index: 1, kind: input, shape index: {}]   ;;  %s277_s2 = inlined_call_operand.hbm [shape: f32[8,32], index: 2, kind: output, shape index: {}]  }
   0x1   :  { %8 = vsyncpa [#allocation6], 0 }
   0x2   :  { %9 = vsyncpa [#allocation4], 0 }
   0x3   :  { %14 = vsyncadd [#allocation3], 128  ;;  %s208_s9 = smov [#allocation2]   ;;  %s136_s13 = scalar_lea.hbm %s275_s0, 128 }
   0x4   :  { %s15_s10 = sshll.u32 %s208_s9, 4  ;;  %p137_p0 = scmp.ne.s32.totalorder %s275_s0, %s136_s13  ;;  %s16_s10 = int_to_ptr.vmem [resolvable:$true] %s15_s10 }
   0x5   :  { %p140_p1 = scmp.lt.u32.totalorder %s136_s13, %s275_s0 }
   0x7   :  { %p142_p2 = pnand %p140_p1, %p137_p0 }
   0x9   :  { %145 = shalt.err (!%p142_p2)
}
   0xa   :  { %s146_s18 = scalar_lea.vmem %s16_s10, 128  ;;  %s150_s19 = scalar_lea.vmem %s16_s10, 256 }
   0xb   :  { %p147_p3 = scmp.ne.s32.totalorder %s16_s10, %s146_s18  ;;  %p151_p4 = scmp.lt.s32.totalorder %s16_s10, %s16_s10 }
   0xc   :  { %p152_p5 = scmp.lt.s32.totalorder %s150_s19, %s146_s18 }
   0xe   :  { %p153_p6 = por %p152_p5, %p151_p4 }
  0x10   :  { %p154_p7 = pnand %p153_p6, %p147_p3 }
  0x12   :  { %157 = shalt.err (!%p154_p7)
}
  0x13   :  { %s209_s20 = smov 128   ;;  %s210_s21 = smov 8  }
  0x14   :  { %21 = dma.hbm_to_vmem [thread:$0]  %s275_s0, 128, %s16_s10, [#allocation3], %s209_s20, %s209_s20, %s210_s21  }
  0x15   :  { %s211_s24 = smov [#allocation5]   ;;  %s158_s28 = scalar_lea.hbm %s276_s1, 512 }
  0x16   :  { %s27_s25 = sshll.u32 %s211_s24, 4  ;;  %p159_p8 = scmp.ne.s32.totalorder %s276_s1, %s158_s28  ;;  %s28_s25 = int_to_ptr.vmem [resolvable:$true] %s27_s25 }
  0x17   :  { %p162_p9 = scmp.lt.u32.totalorder %s158_s28, %s276_s1 }
  0x19   :  { %p164_p10 = pnand %p162_p9, %p159_p8 }
  0x1b   :  { %167 = shalt.err (!%p164_p10)
}
  0x1c   :  { %s168_s5 = scalar_lea.vmem %s28_s25, 512  ;;  %p173_p12 = scmp.lt.s32.totalorder %s28_s25, %s28_s25 }
  0x1d   :  { %p169_p11 = scmp.ne.s32.totalorder %s28_s25, %s168_s5  ;;  %p174_p13 = scmp.lt.s32.totalorder %s168_s5, %s168_s5 }
  0x1f   :  { %p175_p0 = por %p174_p13, %p173_p12 }
  0x21   :  { %p176_p1 = pnand %p175_p0, %p169_p11 }
  0x23   :  { %179 = shalt.err (!%p176_p1)
}
  0x24   :  { %33 = dma.hbm_to_vmem [thread:$0]  %s276_s1, 512, %s28_s25, [#allocation6], %s209_s20, %s209_s20, %s210_s21  }
  0x25   :  { %202 = dma.done.wait [#allocation3], 256  }
  0x26   :  { %203 = vsyncadd [#allocation3], 4294967040 }
  0x27   :  { %204 = dma.done.wait [#allocation6], 512  }
  0x28   :  { %205 = vsyncadd [#allocation6], 4294966784  ;;  %v212_v0 = vmov 0.0   ;;  %vm213_vm0 = vmmov 0   ;;  %v44_v1 = vld [vmem:[#allocation5] sm:$0xff]  ;;  %v45_v2 = vld [vmem:[#allocation5 + $0x8] sm:$0xff] }
  0x29   :  { %121 = vmatprep.subr.bf16.mxu0 %v212_v0  ;;  %125 = vmatprep.mubr.msk.bf16.mxu0 %vm213_vm0, %v212_v0  ;;  %v46_v3 = vld [vmem:[#allocation5 + $0x10] sm:$0xff]  ;;  %v48_v4 = vpack.c.bf16 %v45_v2, %v44_v1  ;;  %v47_v5 = vld [vmem:[#allocation5 + $0x18] sm:$0xff]  ;;  %vm50_vm1 = vcmask 261120  }
  0x2a   :  { %v49_v6 = vpack.c.bf16 %v47_v5, %v46_v3  ;;  %v41_v7 = vld [vmem:[#allocation2] sm:$0xff]  ;;  %v42_v8 = vld [vmem:[#allocation2 + $0x8] sm:$0xff] }
  0x2b   :  { %122 = vmatpush3.bf16.msra.mxu0 %v48_v4  ;;  %v43_v9 = vpack.c.bf16 %v42_v8, %v41_v7 }
  0x2c   :  { %123 = vmatprep.subr.bf16.mxu0 %v212_v0 }
  0x2f   :  { %124 = vmatpush3.bf16.msra.mxu0 %v49_v6 }
  0x32   :  { %126 = vmatmul.mubr.msk.bf16.vlgmr.msra.gmra.mrb[0].mxu0 %vm50_vm1, %v43_v9 }
 0x105   :  { %v88_v10 = vpop.f32.mrb[0].mxu0 }
 0x106   :  { %v95_v11 = vmax.f32 %v88_v10, 0.0  ;;  %v127_v12 = vpop.f32.mrb[1].mxu0 }
 0x107   :  { %v91_v13 = vpop.f32.mrb[2].mxu0 }
 0x108   :  { %97 = vst [vmem:[#allocation7] sm:$0xff] %v95_v11  ;;  %v96_v14 = vmax.f32 %v91_v13, 0.0  ;;  %v128_v15 = vpop.f32.mrb[3].mxu0 }
 0x10a   :  { %98 = vst [vmem:[#allocation7 + $0x8] sm:$0xff] %v96_v14 }
 0x10b   :  { %103 = vsyncadd [#allocation4], 128  ;;  %s214_s1 = smov [#allocation7]  }
 0x10c   :  { %s104_s7 = sshll.u32 %s214_s1, 4  ;;  %s105_s7 = int_to_ptr.vmem [resolvable:$true] %s104_s7 }
 0x10d   :  { %s180_s8 = scalar_lea.vmem %s105_s7, 128  ;;  %s184_s9 = scalar_lea.vmem %s105_s7, 256 }
 0x10e   :  { %p181_p2 = scmp.ne.s32.totalorder %s105_s7, %s180_s8  ;;  %p185_p3 = scmp.lt.s32.totalorder %s105_s7, %s105_s7 }
 0x10f   :  { %p186_p4 = scmp.lt.s32.totalorder %s184_s9, %s180_s8 }
 0x111   :  { %p187_p5 = por %p186_p4, %p185_p3 }
 0x113   :  { %p188_p6 = pnand %p187_p5, %p181_p2 }
 0x115   :  { %191 = shalt.err (!%p188_p6)
}
 0x116   :  { %s192_s12 = scalar_lea.hbm %s277_s2, 128 }
 0x117   :  { %p193_p7 = scmp.ne.s32.totalorder %s277_s2, %s192_s12  ;;  %p196_p8 = scmp.lt.u32.totalorder %s192_s12, %s277_s2 }
 0x119   :  { %p198_p9 = pnand %p196_p8, %p193_p7 }
 0x11b   :  { %201 = shalt.err (!%p198_p9)
}
 0x11c   :  { %110 = dma.vmem_to_hbm [thread:$0]  %s105_s7, 128, %s277_s2, [#allocation4], %s209_s20, %s209_s20, %s210_s21  }
 0x11d   :  { %206 = dma.done.wait [#allocation4], 256  }
 0x11e   :  { %207 = vsyncadd [#allocation4], 4294967040 }
 0x11f   :  { %114 = vsyncpa [#allocation3], 1 }
 0x120   :  { %115 = vsyncpa [#allocation6], 1 }
 0x121   :  { %116 = vsyncpa [#allocation4], 1 }

</bundles_post_ra>
